<compile_context>
chip_gen: v6e
topology: v6e:2x2x1
jax: 0.10.0
libtpu: 0.0.40
codegen_flags: <defaults>
</compile_context>

<pallas_src>
import functools

import jax
import jax.numpy as jnp
from jax.experimental import pallas as pl
from jax.experimental.pallas import tpu as pltpu


# ----------------------------- Pallas kernel -------------------------------
def nes_kernel(u_ids_ref, i_ids_ref, au_ref, bu_ref, ai_ref, bi_ref, out_ref,
               *, u_splits, i_splits):
    """One batch tile of TB samples, batch laid out along lanes.

    u_ids_ref / i_ids_ref : (1, 3, TB) int32  raw per-feature ids
    au_ref / ai_ref       : (H+2, N)   f32    folded tower tables
    bu_ref / bi_ref       : (H+2, 1)   f32    folded bias columns
    out_ref               : (1, 1, TB) f32    lane-dense scores
    u_splits / i_splits   : per-feature row-block heights (each a multiple of
                            8 sublanes) summing to N
    """
    tb = out_ref.shape[-1]

    def tower(ids_ref, a_ref, b_ref, splits):
        ids = ids_ref[0]                                    # (3, TB) int32
        # Range-restricted one-hots: each feature only compares against its
        # own (8-aligned) row block, then concat along sublanes.
        blocks = []
        for f, n_pad in enumerate(splits):
            iota = jax.lax.broadcasted_iota(jnp.int32, (n_pad, tb), 0)
            blocks.append((iota == ids[f:f + 1, :]).astype(jnp.float32))
        mh = jnp.concatenate(blocks, axis=0)                # (N, TB) one-hot
        # Single MXU matmul = gather + MLP + bias lookup, all folded.
        return jnp.dot(a_ref[...], mh,
                       preferred_element_type=jnp.float32) + b_ref[...]

    u = tower(u_ids_ref, au_ref, bu_ref, u_splits)          # (H+2, TB)
    v = tower(i_ids_ref, ai_ref, bi_ref, i_splits)          # (H+2, TB)
    # rows 0..H-1: dot similarity; row H: user_bias*1; row H+1: 1*item_bias.
    out_ref[0] = jnp.sum(u * v, axis=0, keepdims=True)      # (1, TB)


def _round_up(x, m):
    return (x + m - 1) // m * m


def nes_score_pallas(u_ids, i_ids, au, buc, ai, bic, u_splits, i_splits, batch):
    """u_ids/i_ids: (n_tiles, 3, TB) int32 (padded). Returns (batch,) scores."""
    n_tiles, _, tb = u_ids.shape
    hext = au.shape[0]                      # hidden + 2
    nu, ni = au.shape[1], ai.shape[1]

    ids_spec = pl.BlockSpec((1, 3, tb), lambda i: (i, 0, 0))

    def const2d(a):                         # whole array, resident across grid
        return pl.BlockSpec(a.shape, lambda i: (0, 0))

    flops = 2 * n_tiles * tb * (hext * (nu + ni) + hext)
    bytes_accessed = ((u_ids.size + i_ids.size) * 4 + n_tiles * tb * 4 +
                      4 * (au.size + buc.size + ai.size + bic.size))

    kernel = functools.partial(nes_kernel, u_splits=u_splits, i_splits=i_splits)

    out = pl.pallas_call(
        kernel,
        out_shape=jax.ShapeDtypeStruct((n_tiles, 1, tb), jnp.float32),
        grid=(n_tiles,),
        in_specs=[ids_spec, ids_spec,
                  const2d(au), const2d(buc), const2d(ai), const2d(bic)],
        out_specs=pl.BlockSpec((1, 1, tb), lambda i: (i, 0, 0)),
        compiler_params=pltpu.CompilerParams(
            dimension_semantics=("parallel",)),
        cost_estimate=pl.CostEstimate(
            flops=flops, transcendentals=0, bytes_accessed=bytes_accessed),
    )(u_ids, i_ids, au, buc, ai, bic)
    return out.reshape(n_tiles * tb)[:batch]


# ------------------------ One-time parameter prep --------------------------
def _prep_tower(id_emb, f1_emb, f2_emb, bias_emb, w, b, *, bias_row_first):
    """Fold the tower MLP into the stacked gather table.

    Column layout: [id rows pad8 | feat1 rows pad8 | feat2 rows pad8].
    Returns (table (H+2, N), bias_col (H+2, 1), splits (3 ints)).
    """
    n0, d_id = id_emb.shape
    n1, d_f = f1_emb.shape
    n2, _ = f2_emb.shape
    d_in = d_id + 2 * d_f
    hidden = w.shape[1]
    n0p, n1p, n2p = _round_up(n0, 8), _round_up(n1, 8), _round_up(n2, 8)
    n_total = n0p + n1p + n2p

    # Block-diagonal stacked embedding table S: (n_total, d_in).
    s = jnp.zeros((n_total, d_in), jnp.float32)
    s = s.at[:n0, :d_id].set(id_emb)
    s = s.at[n0p:n0p + n1, d_id:d_id + d_f].set(f1_emb)
    s = s.at[n0p + n1p:n0p + n1p + n2, d_id + d_f:].set(f2_emb)

    # Fold MLP weight: A = (S @ W).T -> (hidden, n_total).
    a = jnp.dot(s, w, precision=jax.lax.Precision.HIGHEST).T

    bias_row = jnp.zeros((1, n_total), jnp.float32).at[0, :n0].set(bias_emb[:, 0])
    zeros_row = jnp.zeros((1, n_total), jnp.float32)
    b_col = b.reshape(hidden, 1).astype(jnp.float32)
    zero1 = jnp.zeros((1, 1), jnp.float32)
    one1 = jnp.ones((1, 1), jnp.float32)

    if bias_row_first:           # user tower: [A; bias_row; zeros], b'=[b;0;1]
        table = jnp.concatenate([a, bias_row, zeros_row], axis=0)
        bcol = jnp.concatenate([b_col, zero1, one1], axis=0)
    else:                        # item tower: [A; zeros; bias_row], b'=[b;1;0]
        table = jnp.concatenate([a, zeros_row, bias_row], axis=0)
        bcol = jnp.concatenate([b_col, one1, zero1], axis=0)
    return table, bcol, (n0p, n1p, n2p)


def prepare_nes_params(params):
    """One-time prep (hoisted out of the per-call jitted path)."""
    au, buc, u_splits = _prep_tower(
        params["user_id_emb"], params["user_age_emb"], params["user_cty_emb"],
        params["user_bias"], params["wu"], params["bu"], bias_row_first=True)
    ai, bic, i_splits = _prep_tower(
        params["item_id_emb"], params["item_cat_emb"], params["item_brd_emb"],
        params["item_bias"], params["wi"], params["bi"], bias_row_first=False)
    prepared = dict(au=au, bu=buc, ai=ai, bi=bic)
    meta = dict(u_splits=u_splits, i_splits=i_splits)
    return prepared, meta


# ----------------------------- Forward (glue) ------------------------------
def _choose_tb(b):
    """Lane-dense batch tile: >=2 grid steps when the batch allows (v7x dual
    TensorCore), tile a multiple of 256 and <=2048 to amortize the ~0.35us
    per-grid-step overhead without VMEM concerns."""
    b128 = _round_up(b, 128)
    if b128 <= 256:
        return b128
    tb = _round_up((b128 + 1) // 2, 256)
    return min(tb, 2048)


def _pack_ids(feats, tb, b_pad):
    """(B, 3) int32 -> (n_tiles, 3, TB) int32."""
    b = feats.shape[0]
    ids = feats.astype(jnp.int32)
    ids = jnp.pad(ids, ((0, b_pad - b), (0, 0)))      # padded lanes read id 0
    n_tiles = b_pad // tb
    return ids.T.reshape(3, n_tiles, tb).transpose(1, 0, 2)


@functools.partial(jax.jit, static_argnames=("u_splits", "i_splits"))
def nes_forward(prepared, users_features, items_features, *, u_splits, i_splits):
    b = users_features.shape[0]
    tb = _choose_tb(b)
    b_pad = _round_up(b, tb)
    u_ids = _pack_ids(users_features, tb, b_pad)
    i_ids = _pack_ids(items_features, tb, b_pad)
    return nes_score_pallas(u_ids, i_ids,
                            prepared["au"], prepared["bu"],
                            prepared["ai"], prepared["bi"],
                            u_splits, i_splits, b)                      # (B,)


# --------------------------- Params & reference ----------------------------
def init_params(key):
    k = jax.random.split(key, 12)
    n_users, n_items = 50, 80
    id_dim, feat_dim, hidden = 32, 8, 32

    def tbl(kk, n, d):
        return jax.random.normal(kk, (n, d), jnp.float32) * 0.1

    params = dict(
        # user feature embedding tables (user_id, age_bucket, country)
        user_id_emb=tbl(k[0], n_users + 1, id_dim),
        user_age_emb=tbl(k[1], 10, feat_dim),
        user_cty_emb=tbl(k[2], 5, feat_dim),
        # item feature embedding tables (item_id, category, brand)
        item_id_emb=tbl(k[3], n_items + 1, id_dim),
        item_cat_emb=tbl(k[4], 12, feat_dim),
        item_brd_emb=tbl(k[5], 7, feat_dim),
        # bias embeddings (n+1, 1)
        user_bias=tbl(k[6], n_users + 1, 1),
        item_bias=tbl(k[7], n_items + 1, 1),
        # tower MLPs: Linear(48 -> 32) each
        wu=jax.random.normal(k[8], (id_dim + 2 * feat_dim, hidden), jnp.float32) * 0.1,
        bu=jax.random.normal(k[9], (1, hidden), jnp.float32) * 0.1,
        wi=jax.random.normal(k[10], (id_dim + 2 * feat_dim, hidden), jnp.float32) * 0.1,
        bi=jax.random.normal(k[11], (1, hidden), jnp.float32) * 0.1,
    )
    return params


def encode_user(params, users_features):
    uid, age, cty = (users_features[:, 0], users_features[:, 1],
                     users_features[:, 2])
    return jnp.concatenate([
        jnp.take(params["user_id_emb"], uid, axis=0),
        jnp.take(params["user_age_emb"], age, axis=0),
        jnp.take(params["user_cty_emb"], cty, axis=0),
    ], axis=1)


def encode_item(params, items_features):
    iid, cat, brd = (items_features[:, 0], items_features[:, 1],
                     items_features[:, 2])
    return jnp.concatenate([
        jnp.take(params["item_id_emb"], iid, axis=0),
        jnp.take(params["item_cat_emb"], cat, axis=0),
        jnp.take(params["item_brd_emb"], brd, axis=0),
    ], axis=1)


def nes_forward_ref(params, users_features, items_features):
    """Pure-JAX reference mirroring the PyTorch forward."""
    u = encode_user(params, users_features) @ params["wu"] + params["bu"]
    i = encode_item(params, items_features) @ params["wi"] + params["bi"]
    yhat = jnp.sum(u * i, axis=-1)
    yhat = yhat + jnp.squeeze(
        jnp.take(params["user_bias"], users_features[:, 0], axis=0), -1)
    yhat = yhat + jnp.squeeze(
        jnp.take(params["item_bias"], items_features[:, 0], axis=0), -1)
    return yhat


if __name__ == "__main__":
    key = jax.random.PRNGKey(0)
    pkey, ukey, ikey = jax.random.split(key, 3)
    params = init_params(pkey)
    prepared, meta = prepare_nes_params(params)   # one-time, hoisted out of jit

    B = 8
    # users_features columns: [user_id, age_bucket, country]
    users_features = jnp.stack([
        jax.random.randint(ukey, (B,), 0, 50),
        jax.random.randint(jax.random.fold_in(ukey, 1), (B,), 0, 10),
        jax.random.randint(jax.random.fold_in(ukey, 2), (B,), 0, 5),
    ], axis=1).astype(jnp.int32)
    # items_features columns: [item_id, category, brand]
    items_features = jnp.stack([
        jax.random.randint(ikey, (B,), 0, 80),
        jax.random.randint(jax.random.fold_in(ikey, 1), (B,), 0, 12),
        jax.random.randint(jax.random.fold_in(ikey, 2), (B,), 0, 7),
    ], axis=1).astype(jnp.int32)

    yhat = nes_forward(prepared, users_features, items_features,
                       u_splits=meta["u_splits"], i_splits=meta["i_splits"])
    yhat = jax.block_until_ready(yhat)

    yref = jax.block_until_ready(
        nes_forward_ref(params, users_features, items_features))
    assert yhat.shape == (B,)
    assert jnp.allclose(yhat, yref, atol=1e-5, rtol=1e-5), (yhat, yref)

    print("KERNEL_OK")
</pallas_src>

<mosaic_0001>
module attributes {stable_mosaic.version = 11 : i64} {
  func.func @nes_kernel(%arg0: i32, %arg1: memref<1x3x128xi32, #tpu.memory_space<vmem>>, %arg2: memref<1x3x128xi32, #tpu.memory_space<vmem>>, %arg3: memref<34x80xf32, #tpu.memory_space<vmem>>, %arg4: memref<34x1xf32, #tpu.memory_space<vmem>>, %arg5: memref<34x112xf32, #tpu.memory_space<vmem>>, %arg6: memref<34x1xf32, #tpu.memory_space<vmem>>, %arg7: memref<1x1x128xf32, #tpu.memory_space<vmem>>) attributes {dimension_semantics = [#tpu.dimension_semantics<parallel>], iteration_bounds = array<i64: 1>, scalar_prefetch = 0 : i64, scratch_operands = 0 : i64, tpu.core_type = #tpu.core_type<tc>, window_params = [{transform_indices = @transform_0, window_bounds = array<i64: 1, 3, 128>}, {transform_indices = @transform_1, window_bounds = array<i64: 1, 3, 128>}, {pipeline_mode = #tpu.pipeline_mode<synchronous>, transform_indices = @transform_2, window_bounds = array<i64: 34, 80>}, {pipeline_mode = #tpu.pipeline_mode<synchronous>, transform_indices = @transform_3, window_bounds = array<i64: 34, 1>}, {pipeline_mode = #tpu.pipeline_mode<synchronous>, transform_indices = @transform_4, window_bounds = array<i64: 34, 112>}, {pipeline_mode = #tpu.pipeline_mode<synchronous>, transform_indices = @transform_5, window_bounds = array<i64: 34, 1>}, {transform_indices = @transform_6, window_bounds = array<i64: 1, 1, 128>}]} {
    %c0 = arith.constant 0 : index
    %c0_0 = arith.constant 0 : index
    %c0_1 = arith.constant 0 : index
    %0 = vector.load %arg1[%c0, %c0_0, %c0_1] : memref<1x3x128xi32, #tpu.memory_space<vmem>>, vector<1x3x128xi32>
    %1 = vector.shape_cast %0 : vector<1x3x128xi32> to vector<3x128xi32>
    %2 = tpu.iota {dimensions = array<i32: 0>} : vector<56x128xi32>
    %3 = vector.extract_strided_slice %1 {offsets = [0, 0], sizes = [1, 128], strides = [1, 1]} : vector<3x128xi32> to vector<1x128xi32>
    %4 = vector.broadcast %3 : vector<1x128xi32> to vector<56x128xi32>
    %5 = arith.cmpi eq, %2, %4 : vector<56x128xi32>
    %6 = arith.extui %5 : vector<56x128xi1> to vector<56x128xi32>
    %7 = arith.sitofp %6 : vector<56x128xi32> to vector<56x128xf32>
    %8 = tpu.iota {dimensions = array<i32: 0>} : vector<16x128xi32>
    %9 = vector.extract_strided_slice %1 {offsets = [1, 0], sizes = [1, 128], strides = [1, 1]} : vector<3x128xi32> to vector<1x128xi32>
    %10 = vector.broadcast %9 : vector<1x128xi32> to vector<16x128xi32>
    %11 = arith.cmpi eq, %8, %10 : vector<16x128xi32>
    %12 = arith.extui %11 : vector<16x128xi1> to vector<16x128xi32>
    %13 = arith.sitofp %12 : vector<16x128xi32> to vector<16x128xf32>
    %14 = tpu.iota {dimensions = array<i32: 0>} : vector<8x128xi32>
    %15 = vector.extract_strided_slice %1 {offsets = [2, 0], sizes = [1, 128], strides = [1, 1]} : vector<3x128xi32> to vector<1x128xi32>
    %16 = vector.broadcast %15 : vector<1x128xi32> to vector<8x128xi32>
    %17 = arith.cmpi eq, %14, %16 : vector<8x128xi32>
    %18 = arith.extui %17 : vector<8x128xi1> to vector<8x128xi32>
    %19 = arith.sitofp %18 : vector<8x128xi32> to vector<8x128xf32>
    %20 = tpu.concatenate %7, %13, %19 in 0 : vector<56x128xf32>, vector<16x128xf32>, vector<8x128xf32> -> vector<80x128xf32>
    %c0_2 = arith.constant 0 : index
    %c0_3 = arith.constant 0 : index
    %21 = vector.load %arg3[%c0_2, %c0_3] : memref<34x80xf32, #tpu.memory_space<vmem>>, vector<34x80xf32>
    %cst = arith.constant dense<0.000000e+00> : vector<34x128xf32>
    %22 = tpu.matmul %21, %20, %cst {dimension_numbers = #tpu.dot_dimension_numbers<[1], [0], [0], [1], [0, 0, 1, 1], [], []>} : vector<34x80xf32>, vector<80x128xf32>, vector<34x128xf32> -> vector<34x128xf32>
    %c0_4 = arith.constant 0 : index
    %c0_5 = arith.constant 0 : index
    %23 = vector.load %arg4[%c0_4, %c0_5] : memref<34x1xf32, #tpu.memory_space<vmem>>, vector<34x1xf32>
    %24 = vector.broadcast %23 : vector<34x1xf32> to vector<34x128xf32>
    %25 = arith.addf %22, %24 : vector<34x128xf32>
    %c0_6 = arith.constant 0 : index
    %c0_7 = arith.constant 0 : index
    %c0_8 = arith.constant 0 : index
    %26 = vector.load %arg2[%c0_6, %c0_7, %c0_8] : memref<1x3x128xi32, #tpu.memory_space<vmem>>, vector<1x3x128xi32>
    %27 = vector.shape_cast %26 : vector<1x3x128xi32> to vector<3x128xi32>
    %28 = tpu.iota {dimensions = array<i32: 0>} : vector<88x128xi32>
    %29 = vector.extract_strided_slice %27 {offsets = [0, 0], sizes = [1, 128], strides = [1, 1]} : vector<3x128xi32> to vector<1x128xi32>
    %30 = vector.broadcast %29 : vector<1x128xi32> to vector<88x128xi32>
    %31 = arith.cmpi eq, %28, %30 : vector<88x128xi32>
    %32 = arith.extui %31 : vector<88x128xi1> to vector<88x128xi32>
    %33 = arith.sitofp %32 : vector<88x128xi32> to vector<88x128xf32>
    %34 = tpu.iota {dimensions = array<i32: 0>} : vector<16x128xi32>
    %35 = vector.extract_strided_slice %27 {offsets = [1, 0], sizes = [1, 128], strides = [1, 1]} : vector<3x128xi32> to vector<1x128xi32>
    %36 = vector.broadcast %35 : vector<1x128xi32> to vector<16x128xi32>
    %37 = arith.cmpi eq, %34, %36 : vector<16x128xi32>
    %38 = arith.extui %37 : vector<16x128xi1> to vector<16x128xi32>
    %39 = arith.sitofp %38 : vector<16x128xi32> to vector<16x128xf32>
    %40 = tpu.iota {dimensions = array<i32: 0>} : vector<8x128xi32>
    %41 = vector.extract_strided_slice %27 {offsets = [2, 0], sizes = [1, 128], strides = [1, 1]} : vector<3x128xi32> to vector<1x128xi32>
    %42 = vector.broadcast %41 : vector<1x128xi32> to vector<8x128xi32>
    %43 = arith.cmpi eq, %40, %42 : vector<8x128xi32>
    %44 = arith.extui %43 : vector<8x128xi1> to vector<8x128xi32>
    %45 = arith.sitofp %44 : vector<8x128xi32> to vector<8x128xf32>
    %46 = tpu.concatenate %33, %39, %45 in 0 : vector<88x128xf32>, vector<16x128xf32>, vector<8x128xf32> -> vector<112x128xf32>
    %c0_9 = arith.constant 0 : index
    %c0_10 = arith.constant 0 : index
    %47 = vector.load %arg5[%c0_9, %c0_10] : memref<34x112xf32, #tpu.memory_space<vmem>>, vector<34x112xf32>
    %cst_11 = arith.constant dense<0.000000e+00> : vector<34x128xf32>
    %48 = tpu.matmul %47, %46, %cst_11 {dimension_numbers = #tpu.dot_dimension_numbers<[1], [0], [0], [1], [0, 0, 1, 1], [], []>} : vector<34x112xf32>, vector<112x128xf32>, vector<34x128xf32> -> vector<34x128xf32>
    %c0_12 = arith.constant 0 : index
    %c0_13 = arith.constant 0 : index
    %49 = vector.load %arg6[%c0_12, %c0_13] : memref<34x1xf32, #tpu.memory_space<vmem>>, vector<34x1xf32>
    %50 = vector.broadcast %49 : vector<34x1xf32> to vector<34x128xf32>
    %51 = arith.addf %48, %50 : vector<34x128xf32>
    %52 = arith.mulf %25, %51 : vector<34x128xf32>
    %cst_14 = arith.constant dense<0.000000e+00> : vector<128xf32>
    %53 = vector.multi_reduction <add>, %52, %cst_14 [0] : vector<34x128xf32> to vector<128xf32>
    %54 = vector.shape_cast %53 : vector<128xf32> to vector<1x128xf32>
    %c0_15 = arith.constant 0 : index
    %c0_16 = arith.constant 0 : index
    %c0_17 = arith.constant 0 : index
    %55 = vector.load %arg7[%c0_15, %c0_16, %c0_17] : memref<1x1x128xf32, #tpu.memory_space<vmem>>, vector<1x1x128xf32>
    %56 = vector.shape_cast %55 : vector<1x1x128xf32> to vector<1x128xf32>
    %57 = vector.shape_cast %54 : vector<1x128xf32> to vector<1x1x128xf32>
    tpu.vector_store %arg7[%c0_15, %c0_16, %c0_17], %57 {strides = array<i32>} : memref<1x1x128xf32, #tpu.memory_space<vmem>>, vector<1x1x128xf32>,
    return
  }
  func.func @transform_0(%arg0: i32) -> (i32, i32, i32) {
    %c0_i32 = arith.constant 0 : i32
    %c0_i32_0 = arith.constant 0 : i32
    %c0_i32_1 = arith.constant 0 : i32
    return %arg0, %c0_i32, %c0_i32_0 : i32, i32, i32
  }
  func.func @transform_1(%arg0: i32) -> (i32, i32, i32) {
    %c0_i32 = arith.constant 0 : i32
    %c0_i32_0 = arith.constant 0 : i32
    %c0_i32_1 = arith.constant 0 : i32
    return %arg0, %c0_i32, %c0_i32_0 : i32, i32, i32
  }
  func.func @transform_2(%arg0: i32) -> (i32, i32) {
    %c0_i32 = arith.constant 0 : i32
    %c0_i32_0 = arith.constant 0 : i32
    %c0_i32_1 = arith.constant 0 : i32
    return %c0_i32, %c0_i32_0 : i32, i32
  }
  func.func @transform_3(%arg0: i32) -> (i32, i32) {
    %c0_i32 = arith.constant 0 : i32
    %c0_i32_0 = arith.constant 0 : i32
    %c0_i32_1 = arith.constant 0 : i32
    return %c0_i32, %c0_i32_0 : i32, i32
  }
  func.func @transform_4(%arg0: i32) -> (i32, i32) {
    %c0_i32 = arith.constant 0 : i32
    %c0_i32_0 = arith.constant 0 : i32
    %c0_i32_1 = arith.constant 0 : i32
    return %c0_i32, %c0_i32_0 : i32, i32
  }
  func.func @transform_5(%arg0: i32) -> (i32, i32) {
    %c0_i32 = arith.constant 0 : i32
    %c0_i32_0 = arith.constant 0 : i32
    %c0_i32_1 = arith.constant 0 : i32
    return %c0_i32, %c0_i32_0 : i32, i32
  }
  func.func @transform_6(%arg0: i32) -> (i32, i32, i32) {
    %c0_i32 = arith.constant 0 : i32
    %c0_i32_0 = arith.constant 0 : i32
    %c0_i32_1 = arith.constant 0 : i32
    return %arg0, %c0_i32, %c0_i32_0 : i32, i32, i32
  }
}

</mosaic_0001>

<bundles_post_ra>
// kernel: nes_forward.1
= control target key start
LH: loop header
LB: loop body
LE: loop exit
PB: predicated region body
PF: predicated region fallthrough
CT: control target
= control target key end

     0   :  { %v24_v0 = vlaneseq  ;;  %v613_v1 = vmov 0.0   ;;  %vm614_vm0 = vmmov 0   ;;  %v615_v5 = vmov 0   ;;  %s852_s0 = inlined_call_operand.vmem [shape: s32[1,3,128], index: 0, kind: input, shape index: {}]   ;;  %s853_s1 = inlined_call_operand.vmem [shape: s32[1,3,128], index: 1, kind: input, shape index: {}]   ;;  %s854_s5 = inlined_call_operand.vmem [shape: f32[34,1], index: 5, kind: input, shape index: {}]   ;;  %s855_s3 = inlined_call_operand.vmem [shape: f32[34,1], index: 3, kind: input, shape index: {}]   ;;  %s856_s2 = inlined_call_operand.vmem [shape: f32[34,80], index: 2, kind: input, shape index: {}]   ;;  %s857_s4 = inlined_call_operand.vmem [shape: f32[34,112], index: 4, kind: input, shape index: {}]   ;;  %s858_s6 = inlined_call_operand.vmem [shape: f32[1,1,128], index: 6, kind: output, shape index: {}]  }
   0x1   :  { %529 = vmatprep.subr.mxu0 %v613_v1  ;;  %564 = vmatprep.subr.mxu1 %v613_v1  ;;  %v23_v3 = vld [vmem:[%s852_s0] sm:$0x7]  ;;  %v616_v20 = vmov 1.0   ;;  %v280_v29 = vld [vmem:[%s854_s5 + $0x8] sm:$0xff]  ;;  %v281_v32 = vld [vmem:[%s854_s5 + $0x10] sm:$0xff] }
   0x2   :  { %v654_v2 = vshrl.u32 %v24_v0, 7  ;;  %549 = vmatprep.mubr.msk.f32.mxu0 %vm614_vm0, %v613_v1  ;;  %592 = vmatprep.mubr.msk.f32.mxu1 %vm614_vm0, %v613_v1  ;;  %v215_v4 = vld [vmem:[%s853_s1] sm:$0x7]  ;;  %v80_v30 = vld [vmem:[%s855_s3 + $0x8] sm:$0xff]  ;;  %v81_v33 = vld [vmem:[%s855_s3 + $0x10] sm:$0xff] }
   0x3   :  { %612 = vset.pattern.permute.xlu1 %v615_v5  ;;  %611 = vset.pattern.permute.xlu0 %v615_v5  ;;  %v279_v12 = vld [vmem:[%s854_s5] sm:$0xff]  ;;  %v75_v31 = vld [vmem:[%s856_s2 + $0x8] sm:$0xff]  ;;  %v76_v34 = vld [vmem:[%s856_s2 + $0x10] sm:$0xff] }
   0x4   :  { %v34_v6 = vsub.s32 0, %v654_v2  ;;  %v69_v7 = vsub.s32 2, %v654_v2  ;;  %v59_v8 = vsub.s32 1, %v654_v2  ;;  %v670_v9 = vadd.s32 8, %v654_v2  ;;  %v79_v13 = vld [vmem:[%s855_s3] sm:$0xff]  ;;  %286 = vperm.xlu1 %612, %v279_v12   ;;  %v282_v36 = vld [vmem:[%s854_s5 + $0x18] sm:$0xff] }
   0x5   :  { %v679_v16 = vadd.s32 48, %v654_v2  ;;  %v219_v17 = vadd.s32 80, %v654_v2  ;;  %86 = vperm.xlu0 %611, %v79_v13   ;;  %v30_v21 = vadd.s32 40, %v654_v2  ;;  %v218_v22 = vadd.s32 72, %v654_v2  ;;  %v74_v28 = vld [vmem:[%s856_s2] sm:$0xff]  ;;  %v82_v37 = vld [vmem:[%s855_s3 + $0x18] sm:$0xff] }
   0x6   :  { %v70_v10 = vrot.slane %v23_v3, %v69_v7  ;;  %v270_v11 = vrot.slane %v215_v4, %v69_v7  ;;  %v60_v14 = vrot.slane %v23_v3, %v59_v8  ;;  %v260_v15 = vrot.slane %v215_v4, %v59_v8  ;;  %v274_v35 = vld [vmem:[%s857_s4] sm:$0xff]  ;;  %v77_v38 = vld [vmem:[%s856_s2 + $0x18] sm:$0xff]  ;;  %v275_v39 = vld [vmem:[%s857_s4 + $0x8] sm:$0xff] }
   0x7   :  { %v682_v18 = vrot.slane %v23_v3, %v34_v6  ;;  %v685_v19 = vrot.slane %v215_v4, %v34_v6  ;;  %v29_v23 = vadd.s32 32, %v654_v2  ;;  %v217_v24 = vadd.s32 64, %v654_v2  ;;  %v283_v40 = vld [vmem:[%s854_s5 + $0x20] sm:$0x3]  ;;  %v276_v43 = vld [vmem:[%s857_s4 + $0x10] sm:$0xff]  ;;  %v277_v44 = vld [vmem:[%s857_s4 + $0x18] sm:$0xff] }
   0x8   :  { %vm71_vm1 = vcmp.eq.s32.totalorder %v654_v2, %v70_v10  ;;  %vm271_vm2 = vcmp.eq.s32.totalorder %v654_v2, %v270_v11  ;;  %vm62_vm3 = vcmp.eq.s32.totalorder %v670_v9, %v60_v14  ;;  %vm262_vm4 = vcmp.eq.s32.totalorder %v670_v9, %v260_v15  ;;  %291 = vperm.xlu1 %612, %v280_v29   ;;  %v83_v41 = vld [vmem:[%s855_s3 + $0x20] sm:$0x3] }
   0x9   :  { %530 = vmatpush3.msk.msra.mxu0 %vm71_vm1, %v616_v20  ;;  %565 = vmatpush3.msk.msra.mxu1 %vm271_vm2, %v616_v20  ;;  %vm61_vm5 = vcmp.eq.s32.totalorder %v654_v2, %v60_v14  ;;  %vm261_vm6 = vcmp.eq.s32.totalorder %v654_v2, %v260_v15  ;;  %vm42_vm7 = vcmp.eq.s32.totalorder %v679_v16, %v682_v18  ;;  %v28_v25 = vadd.s32 24, %v654_v2  ;;  %v78_v42 = vld [vmem:[%s856_s2 + $0x20] sm:$0x3] }
   0xa   :  { %531 = vmatprep.subr.mxu0 %v613_v1  ;;  %566 = vmatprep.subr.mxu1 %v613_v1  ;;  %vm234_vm8 = vcmp.eq.s32.totalorder %v219_v17, %v685_v19  ;;  %vm41_vm9 = vcmp.eq.s32.totalorder %v30_v21, %v682_v18  ;;  %vm233_vm10 = vcmp.eq.s32.totalorder %v218_v22, %v685_v19  ;;  %v216_v26 = vadd.s32 56, %v654_v2  ;;  %v278_v45 = vld [vmem:[%s857_s4 + $0x20] sm:$0x3] }
   0xb   :  { %532 = vmatpush3.msk.msra.mxu0 %vm62_vm3, %v616_v20  ;;  %567 = vmatpush3.msk.msra.mxu1 %vm262_vm4, %v616_v20  ;;  %vm40_vm11 = vcmp.eq.s32.totalorder %v29_v23, %v682_v18  ;;  %vm232_vm12 = vcmp.eq.s32.totalorder %v217_v24, %v685_v19  ;;  %v27_v27 = vadd.s32 16, %v654_v2  ;;  %vm39_vm13 = vcmp.eq.s32.totalorder %v28_v25, %v682_v18 }
   0xc   :  { %533 = vmatprep.subr.mxu0 %v613_v1  ;;  %568 = vmatprep.subr.mxu1 %v613_v1  ;;  %vm231_vm14 = vcmp.eq.s32.totalorder %v216_v26, %v685_v19  ;;  %vm230_vm1 = vcmp.eq.s32.totalorder %v679_v16, %v685_v19  ;;  %vm37_vm2 = vcmp.eq.s32.totalorder %v670_v9, %v682_v18 }
   0xd   :  { %534 = vmatpush3.msk.msra.mxu0 %vm61_vm5, %v616_v20  ;;  %569 = vmatpush3.msk.msra.mxu1 %vm261_vm6, %v616_v20  ;;  %vm38_vm15 = vcmp.eq.s32.totalorder %v27_v27, %v682_v18  ;;  %vm229_vm3 = vcmp.eq.s32.totalorder %v30_v21, %v685_v19  ;;  %vm36_vm4 = vcmp.eq.s32.totalorder %v654_v2, %v682_v18  ;;  %vm109_vm6 = vcmask 654336  }
   0xe   :  { %535 = vmatprep.subr.mxu0 %v613_v1  ;;  %570 = vmatprep.subr.mxu1 %v613_v1  ;;  %vm228_vm5 = vcmp.eq.s32.totalorder %v29_v23, %v685_v19 }
   0xf   :  { %536 = vmatpush3.msk.msra.mxu0 %vm42_vm7, %v616_v20  ;;  %571 = vmatpush3.msk.msra.mxu1 %vm234_vm8, %v616_v20  ;;  %vm227_vm7 = vcmp.eq.s32.totalorder %v28_v25, %v685_v19  ;;  %vm226_vm8 = vcmp.eq.s32.totalorder %v27_v27, %v685_v19 }
  0x10   :  { %537 = vmatprep.subr.mxu0 %v613_v1  ;;  %572 = vmatprep.subr.mxu1 %v613_v1 }
  0x11   :  { %538 = vmatpush3.msk.msra.mxu0 %vm41_vm9, %v616_v20  ;;  %573 = vmatpush3.msk.msra.mxu1 %vm233_vm10, %v616_v20  ;;  %vm225_vm9 = vcmp.eq.s32.totalorder %v670_v9, %v685_v19  ;;  %vm224_vm10 = vcmp.eq.s32.totalorder %v654_v2, %v685_v19 }
  0x12   :  { %539 = vmatprep.subr.mxu0 %v613_v1  ;;  %574 = vmatprep.subr.mxu1 %v613_v1 }
  0x13   :  { %540 = vmatpush3.msk.msra.mxu0 %vm40_vm11, %v616_v20  ;;  %575 = vmatpush3.msk.msra.mxu1 %vm232_vm12, %v616_v20  ;;  %vm309_vm11 = vcmask 916480  }
  0x14   :  { %541 = vmatprep.subr.mxu0 %v613_v1  ;;  %576 = vmatprep.subr.mxu1 %v613_v1 }
  0x15   :  { %542 = vmatpush3.msk.msra.mxu0 %vm39_vm13, %v616_v20  ;;  %577 = vmatpush3.msk.msra.mxu1 %vm231_vm14, %v616_v20 }
  0x16   :  { %543 = vmatprep.subr.mxu0 %v613_v1  ;;  %578 = vmatprep.subr.mxu1 %v613_v1 }
  0x17   :  { %544 = vmatpush3.msk.msra.mxu0 %vm38_vm15, %v616_v20  ;;  %579 = vmatpush3.msk.msra.mxu1 %vm230_vm1, %v616_v20 }
  0x18   :  { %545 = vmatprep.subr.mxu0 %v613_v1  ;;  %580 = vmatprep.subr.mxu1 %v613_v1 }
  0x19   :  { %546 = vmatpush3.msk.msra.mxu0 %vm37_vm2, %v616_v20  ;;  %581 = vmatpush3.msk.msra.mxu1 %vm229_vm3, %v616_v20 }
  0x1a   :  { %547 = vmatprep.subr.mxu0 %v613_v1  ;;  %582 = vmatprep.subr.mxu1 %v613_v1 }
  0x1b   :  { %548 = vmatpush3.msk.msra.mxu0 %vm36_vm4, %v616_v20  ;;  %583 = vmatpush3.msk.msra.mxu1 %vm228_vm5, %v616_v20 }
  0x1c   :  { %550 = vmatmul.mubr.msk.f32.vlgmr.msra.gmra.mxu0 %vm109_vm6, %v74_v28  ;;  %584 = vmatprep.subr.mxu1 %v613_v1 }
  0x1d   :  { %585 = vmatpush3.msk.msra.mxu1 %vm227_vm7, %v616_v20  ;;  %552 = vmatprep.mubr.msk.f32.mxu0 %vm614_vm0, %v613_v1 }
  0x1e   :  { %586 = vmatprep.subr.mxu1 %v613_v1  ;;  %91 = vperm.xlu0 %611, %v80_v30  }
  0x1f   :  { %587 = vmatpush3.msk.msra.mxu1 %vm226_vm8, %v616_v20  ;;  %296 = vperm.xlu1 %612, %v281_v32  }
  0x20   :  { %553 = vmatmul.mubr.msk.f32.gmra.mxu0 %vm109_vm6, %v75_v31  ;;  %588 = vmatprep.subr.mxu1 %v613_v1 }
  0x21   :  { %589 = vmatpush3.msk.msra.mxu1 %vm225_vm9, %v616_v20  ;;  %555 = vmatprep.mubr.msk.f32.mxu0 %vm614_vm0, %v613_v1 }
  0x22   :  { %590 = vmatprep.subr.mxu1 %v613_v1  ;;  %96 = vperm.xlu0 %611, %v81_v33  }
  0x23   :  { %591 = vmatpush3.msk.msra.mxu1 %vm224_vm10, %v616_v20  ;;  %301 = vperm.xlu1 %612, %v282_v36  }
  0x24   :  { %556 = vmatmul.mubr.msk.f32.gmra.mxu0 %vm109_vm6, %v76_v34  ;;  %593 = vmatmul.mubr.msk.f32.vlgmr.msra.gmra.mxu1 %vm309_vm11, %v274_v35 }
  0x25   :  { %558 = vmatprep.mubr.msk.f32.mxu0 %vm614_vm0, %v613_v1  ;;  %595 = vmatprep.mubr.msk.f32.mxu1 %vm614_vm0, %v613_v1 }
  0x26   :  { %101 = vperm.xlu0 %611, %v82_v37  }
  0x27   :  { %306 = vperm.xlu1 %612, %v283_v40  }
  0x28   :  { %559 = vmatmul.mubr.msk.f32.gmra.mxu0 %vm109_vm6, %v77_v38  ;;  %596 = vmatmul.mubr.msk.f32.gmra.mxu1 %vm309_vm11, %v275_v39 }
  0x29   :  { %561 = vmatprep.mubr.msk.f32.mxu0 %vm614_vm0, %v613_v1  ;;  %598 = vmatprep.mubr.msk.f32.mxu1 %vm614_vm0, %v613_v1 }
  0x2a   :  { %106 = vperm.xlu0 %611, %v83_v41  }
  0x2c   :  { %562 = vmatmul.mubr.msk.f32.gmra.mxu0 %vm109_vm6, %v78_v42  ;;  %599 = vmatmul.mubr.msk.f32.gmra.mxu1 %vm309_vm11, %v276_v43 }
  0x2d   :  { %601 = vmatprep.mubr.msk.f32.mxu1 %vm614_vm0, %v613_v1 }
  0x30   :  { %602 = vmatmul.mubr.msk.f32.gmra.mxu1 %vm309_vm11, %v277_v44 }
  0x31   :  { %604 = vmatprep.mubr.msk.f32.mxu1 %vm614_vm0, %v613_v1  ;;  %vm423_vm0 = vcmask 1041408  }
  0x34   :  { %605 = vmatmul.mubr.msk.f32.gmra.mxu1 %vm309_vm11, %v278_v45 }
  0x7f   :  { %v287_v46 = vpop.permute.xlu1 %286 }
  0x80   :  { %v87_v47 = vpop.permute.xlu0 %86 }
  0x83   :  { %v292_v51 = vpop.permute.xlu1 %291 }
  0x99   :  { %v92_v52 = vpop.permute.xlu0 %91 }
  0x9a   :  { %v297_v58 = vpop.permute.xlu1 %296 }
  0x9d   :  { %v97_v59 = vpop.permute.xlu0 %96 }
  0x9e   :  { %v302_v3 = vpop.permute.xlu1 %301 }
  0xa1   :  { %v102_v4 = vpop.permute.xlu0 %101 }
  0xa2   :  { %v307_v19 = vpop.permute.xlu1 %306 }
  0xa5   :  { %v107_v20 = vpop.permute.xlu0 %106 }
  0xdc   :  { %v191_v48 = vpop.f32.mrf.mxu0 }
  0xdd   :  { %v192_v5 = vadd.f32 %v191_v48, %v87_v47 }
  0xde   :  { %v551_v49 = vpop.f32.mrf.mxu0 }
  0xe0   :  { %v196_v50 = vpop.f32.mrf.mxu0 }
  0xe1   :  { %v197_v6 = vadd.f32 %v196_v50, %v92_v52 }
  0xe2   :  { %v554_v53 = vpop.f32.mrf.mxu0 }
  0xe4   :  { %v201_v54 = vpop.f32.mrf.mxu0  ;;  %v391_v55 = vpop.f32.mrf.mxu1 }
  0xe5   :  { %v392_v7 = vadd.f32 %v391_v55, %v287_v46  ;;  %v202_v11 = vadd.f32 %v201_v54, %v97_v59 }
  0xe6   :  { %v557_v56 = vpop.f32.mrf.mxu0  ;;  %v594_v57 = vpop.f32.mrf.mxu1 }
  0xe7   :  { %v415_v15 = vmul.f32 %v392_v7, %v192_v5 }
  0xe8   :  { %v206_v60 = vpop.f32.mrf.mxu0  ;;  %v396_v61 = vpop.f32.mrf.mxu1 }
  0xe9   :  { %v397_v0 = vadd.f32 %v396_v61, %v292_v51  ;;  %v207_v16 = vadd.f32 %v206_v60, %v102_v4 }
  0xea   :  { %v560_v62 = vpop.f32.mrf.mxu0  ;;  %v597_v63 = vpop.f32.mrf.mxu1 }
  0xeb   :  { %v416_v12 = vmul.f32 %v397_v0, %v197_v6 }
  0xec   :  { %v211_v1 = vpop.f32.mrf.mxu0  ;;  %v401_v2 = vpop.f32.mrf.mxu1 }
  0xed   :  { %v402_v8 = vadd.f32 %v401_v2, %v297_v58  ;;  %v420_v21 = vadd.f32 %v416_v12, %v415_v15  ;;  %v212_v24 = vadd.f32 %v211_v1, %v107_v20 }
  0xee   :  { %v600_v9 = vpop.f32.mrf.mxu1  ;;  %v563_v10 = vpop.f32.mrf.mxu0 }
  0xef   :  { %v417_v17 = vmul.f32 %v402_v8, %v202_v11 }
  0xf0   :  { %v406_v13 = vpop.f32.mrf.mxu1 }
  0xf1   :  { %v407_v14 = vadd.f32 %v406_v13, %v302_v3  ;;  %v421_v26 = vadd.f32 %v420_v21, %v417_v17 }
  0xf2   :  { %v603_v18 = vpop.f32.mrf.mxu1 }
  0xf3   :  { %v418_v22 = vmul.f32 %v407_v14, %v207_v16 }
  0xf4   :  { %v411_v23 = vpop.f32.mrf.mxu1 }
  0xf5   :  { %v412_v25 = vadd.f32 %v411_v23, %v307_v19  ;;  %v422_v29 = vadd.f32 %v421_v26, %v418_v22 }
  0xf6   :  { %v606_v27 = vpop.f32.mrf.mxu1 }
  0xf7   :  { %v419_v28 = vmul.f32 %v412_v25, %v212_v24 }
  0xf9   :  { %v424_v30 = vsel %vm423_vm0, %v419_v28, 0.0 }
  0xfa   :  { %v425_v31 = vadd.f32 %v424_v30, %v422_v29 }
  0xfc   :  { %v426_v32 = vrot.slane %v425_v31, 4 }
  0xfe   :  { %v427_v33 = vadd.f32 %v426_v32, %v425_v31 }
 0x100   :  { %v428_v34 = vrot.slane %v427_v33, 2 }
 0x102   :  { %v429_v35 = vadd.f32 %v428_v34, %v427_v33 }
 0x104   :  { %v430_v36 = vrot.slane %v429_v35, 1 }
 0x106   :  { %v431_v37 = vadd.f32 %v430_v36, %v429_v35 }
 0x108   :  { %432 = vst [vmem:[%s858_s6] sm:$0x1] %v431_v37 }

</bundles_post_ra>
